<compile_context>
chip_gen: v5e
topology: v5e:2x2
jax: 0.10.0
libtpu: 0.0.40
codegen_flags: <defaults>
</compile_context>

<pallas_src>
import functools

import jax
import jax.numpy as jnp
from jax.experimental import pallas as pl
from jax.experimental.pallas import tpu as pltpu


def _nsnpau_chunk_kernel(
    xproj_ref,          # (TC, B, 4H) stream-dtype : pre-scaled x projections (+ folded biases)
    whu_ref,            # (2H, 4H) compute-dtype   : fused recurrent weights for the [h | u] state
    h_out_ref,          # (B, H)  f32              : final hidden state
    h_scr, u_scr,       # (B, H)  f32 VMEM scratch : recurrent state carried across chunks
    *, seq_len, chunk, unroll,
):
    H = h_scr.shape[1]
    G = 4 * H
    ci = pl.program_id(0)
    nci = pl.num_programs(0)

    @pl.when(ci == 0)
    def _():
        h_scr[...] = jnp.zeros_like(h_scr)
        u_scr[...] = jnp.zeros_like(u_scr)

    whu = whu_ref[...]                    # loaded once, resident across the whole chunk loop
    mdt = whu.dtype                       # matmul dtype (f32 or bf16); state/elementwise stay f32

    # Per-lane affine (hoisted out of the loop): sigmoid on the 0.5-pre-scaled r|c|o lanes,
    # plain tanh on the a lanes — a single EUP tanh per step over the full (B, 4H) slab.
    lane = jax.lax.broadcasted_iota(jnp.int32, (1, G), 1)
    is_rco = lane < 3 * H
    g_scale = jnp.where(is_rco, 0.5, 1.0).astype(jnp.float32)
    g_shift = jnp.where(is_rco, 0.5, 0.0).astype(jnp.float32)

    t0 = ci * chunk

    def make_step(masked):
        def step(i, carry):
            h, u = carry
            hu = jnp.concatenate([h, u], axis=1).astype(mdt)                 # (B, 2H)
            pre = xproj_ref[i].astype(jnp.float32) + jnp.dot(
                hu, whu, preferred_element_type=jnp.float32)                 # (B, 4H)
            g = jnp.tanh(pre) * g_scale + g_shift        # [sigmoid(r) | sigmoid(c) | sigmoid(o) | tanh(a)]
            r = g[:, :H]
            c = g[:, H:2 * H]
            o = g[:, 2 * H:3 * H]
            a = g[:, 3 * H:]
            u_new = r * u - c * a
            h_new = o * a
            if masked:
                # mask out zero-padded timesteps past seq_len (only the last chunk runs this)
                valid = (t0 + i) < seq_len
                h_new = jnp.where(valid, h_new, h)
                u_new = jnp.where(valid, u_new, u)
            return h_new, u_new
        return step

    def run(masked):
        h, u = jax.lax.fori_loop(0, chunk, make_step(masked),
                                 (h_scr[...], u_scr[...]), unroll=unroll)
        h_scr[...] = h
        u_scr[...] = u

    ragged = (seq_len % chunk) != 0       # static Python bool
    if ragged:
        # ragged-tail mask only traced into the last chunk's loop
        pl.when(ci == nci - 1)(lambda: run(True))
        pl.when(ci != nci - 1)(lambda: run(False))
    else:
        run(False)

    @pl.when(ci == nci - 1)
    def _():
        h_out_ref[...] = h_scr[...]


def nsnpau_forward(x_bsd, params, *, compute_dtype=jnp.float32, chunk=128, unroll=8):
    """x_bsd: (batch, seq_len, input_size) f32 -> (batch, output_size) f32.

    compute_dtype: dtype of the recurrent-matmul operands and of the streamed
    x-projection tensor (bf16 recommended on v6e/v7x; recurrent state and all
    elementwise math remain f32).
    """
    B, S, D = x_bsd.shape
    assert S >= 1
    H = params["W_ir"].shape[0]
    G = 4 * H
    f32 = jnp.float32
    p = params

    # ---- fold the time-parallel x-projection + all additive biases into one big matmul.
    #      r/c/o lanes are pre-scaled by 0.5 so the kernel needs only ONE tanh per step
    #      (sigmoid(z) = 0.5*tanh(z/2) + 0.5). ----
    Wx = jnp.concatenate(
        [0.5 * p["W_ir"].T, 0.5 * p["W_ic"].T, 0.5 * p["W_io"].T, p["W_ia"].T], axis=1
    ).astype(f32)                                                        # (D, 4H)
    bx = jnp.concatenate(
        [
            0.5 * (p["b_ir"] + p["b_hr"] + p["b_ur"]),
            0.5 * (p["b_ic"] + p["b_hc"] + p["b_uc"]),
            0.5 * (p["b_io"] + p["b_ho"] + p["b_uo"]),
            p["b_ia"] + p["b_ua"],
        ]
    ).astype(f32)                                                        # (4H,)

    # ---- SINGLE fused recurrent weight slab for the [h | u] state, (2H, 4H).
    #      NOTE: W_u{r,c,o} are applied UN-transposed (u @ W) in the PyTorch module,
    #      while W_ua is transposed (u @ W_ua.T); the a-gate does not see h -> zero block.
    #      (For very large H one could drop the zero block and split the matmul again.) ----
    Wh = jnp.concatenate(
        [0.5 * p["W_hr"].T, 0.5 * p["W_hc"].T, 0.5 * p["W_ho"].T, jnp.zeros((H, H), f32)],
        axis=1)
    Wu = jnp.concatenate(
        [0.5 * p["W_ur"], 0.5 * p["W_uc"], 0.5 * p["W_uo"], p["W_ua"].T], axis=1)
    Whu = jnp.concatenate([Wh, Wu], axis=0).astype(compute_dtype)        # (2H, 4H)

    # time-major x, projected once for all timesteps (MXU-friendly M = S*B), then streamed
    # to the kernel in compute_dtype (bf16 halves HBM traffic + chunk VMEM).
    x_sbd = jnp.transpose(x_bsd, (1, 0, 2)).astype(f32)                  # (S, B, D)
    xproj = jnp.einsum("sbd,dg->sbg", x_sbd, Wx) + bx[None, None, :]     # (S, B, 4H) f32
    stream_dtype = compute_dtype
    xproj = xproj.astype(stream_dtype)

    # ---- chunk the time axis; cap the chunk against a VMEM budget (v7x: 64 MiB physical,
    #      the streamed chunk is double-buffered by BlockSpec and B is sublane-padded to 8). ----
    def pad_to(n, m):
        return ((n + m - 1) // m) * m

    bpad, gpad, hpad = pad_to(B, 8), pad_to(G, 128), pad_to(H, 128)
    stream_bytes = jnp.dtype(stream_dtype).itemsize
    chunk_budget = 24 << 20                                  # budget for the 2x-buffered stream
    tc_cap = max(1, chunk_budget // (2 * bpad * gpad * stream_bytes))
    tc = max(1, min(chunk, S, tc_cap))
    s_pad = pad_to(S, tc)
    if s_pad != S:
        xproj = jnp.pad(xproj, ((0, s_pad - S), (0, 0), (0, 0)))
    num_chunks = s_pad // tc
    unroll_eff = max(1, min(unroll, tc))

    kernel = functools.partial(_nsnpau_chunk_kernel, seq_len=S, chunk=tc, unroll=unroll_eff)

    grid_spec = pltpu.PrefetchScalarGridSpec(
        num_scalar_prefetch=0,
        grid=(num_chunks,),
        in_specs=[
            # stream one time-chunk of pre-projected inputs per grid step
            pl.BlockSpec((tc, B, G), lambda t: (t, 0, 0)),
            # constant fused recurrent weights: whole-array VMEM resident (single copy)
            pl.BlockSpec(memory_space=pltpu.MemorySpace.VMEM),
        ],
        out_specs=pl.BlockSpec((B, H), lambda t: (0, 0)),
        scratch_shapes=[
            pltpu.VMEM((B, H), jnp.float32),   # h_t (f32 state across chunks)
            pltpu.VMEM((B, H), jnp.float32),   # u_t
        ],
    )

    # explicit scoped-VMEM limit: defaults (16 MiB v5e / 32 MiB v6e,v7x) are below physical
    whu_bytes = pad_to(2 * H, 8) * gpad * jnp.dtype(compute_dtype).itemsize
    xchunk_bytes = 2 * tc * bpad * gpad * stream_bytes       # double-buffered streamed chunk
    state_bytes = 4 * bpad * hpad * 4                        # h/u scratch + out block (padded)
    vmem_limit = int(min(max(xchunk_bytes + whu_bytes + state_bytes + (8 << 20), 32 << 20),
                         64 << 20))

    # The recurrence is strictly sequential over time-chunks -> "arbitrary".
    # (On v7x with a large batch one could add a leading "parallel" batch-shard grid axis so
    #  each TensorCore runs an independent batch shard; at B=2 it is not worth duplicating
    #  the h/u state per core.)
    h_final = pl.pallas_call(
        kernel,
        out_shape=jax.ShapeDtypeStruct((B, H), jnp.float32),
        grid_spec=grid_spec,
        compiler_params=pltpu.CompilerParams(
            dimension_semantics=("arbitrary",),
            vmem_limit_bytes=vmem_limit,
        ),
    )(xproj, Whu)

    # dropout_rate = 0.0 -> identity.  Final linear runs once on a tiny tensor.
    out = h_final @ p["W_lin"].T.astype(f32) + p["b_lin"].astype(f32)
    return out


def nsnpau_reference(x_bsd, params):
    """Pure-JAX reference mirroring the PyTorch NSNPAU forward exactly."""
    B, S, D = x_bsd.shape
    H = params["W_ir"].shape[0]
    p = params
    h = jnp.zeros((B, H), jnp.float32)
    u = jnp.zeros((B, H), jnp.float32)
    for t in range(S):
        x_t = x_bsd[:, t, :]
        r = jax.nn.sigmoid(
            x_t @ p["W_ir"].T + p["b_ir"] + h @ p["W_hr"].T + p["b_hr"] + u @ p["W_ur"] + p["b_ur"]
        )
        c = jax.nn.sigmoid(
            x_t @ p["W_ic"].T + p["b_ic"] + h @ p["W_hc"].T + p["b_hc"] + u @ p["W_uc"] + p["b_uc"]
        )
        o = jax.nn.sigmoid(
            x_t @ p["W_io"].T + p["b_io"] + h @ p["W_ho"].T + p["b_ho"] + u @ p["W_uo"] + p["b_uo"]
        )
        a = jnp.tanh(x_t @ p["W_ia"].T + p["b_ia"] + u @ p["W_ua"].T + p["b_ua"])
        u = r * u - c * a
        h = o * a
    return h @ p["W_lin"].T + p["b_lin"]


def init_params(key, input_size, hidden_size, output_size):
    names_shapes = {
        "W_ir": (hidden_size, input_size), "W_hr": (hidden_size, hidden_size),
        "W_ur": (hidden_size, hidden_size),
        "b_ir": (hidden_size,), "b_hr": (hidden_size,), "b_ur": (hidden_size,),
        "W_ic": (hidden_size, input_size), "W_hc": (hidden_size, hidden_size),
        "W_uc": (hidden_size, hidden_size),
        "b_ic": (hidden_size,), "b_hc": (hidden_size,), "b_uc": (hidden_size,),
        "W_io": (hidden_size, input_size), "W_ho": (hidden_size, hidden_size),
        "W_uo": (hidden_size, hidden_size),
        "b_io": (hidden_size,), "b_ho": (hidden_size,), "b_uo": (hidden_size,),
        "W_ia": (hidden_size, input_size), "W_ua": (hidden_size, hidden_size),
        "b_ia": (hidden_size,), "b_ua": (hidden_size,),
        "W_lin": (output_size, hidden_size), "b_lin": (output_size,),
    }
    params = {}
    keys = jax.random.split(key, len(names_shapes))
    for k, (name, shape) in zip(keys, names_shapes.items()):
        scale = 0.2 if len(shape) >= 2 else 0.1   # nonzero biases exercise the bias-fold path
        params[name] = scale * jax.random.normal(k, shape, dtype=jnp.float32)
    return params


if __name__ == "__main__":
    # small shapes consistent with the module: (batch, seq_len, input_size)
    B, S, D, H, O = 2, 8, 8, 32, 16

    key = jax.random.PRNGKey(0)
    k_x, k_p = jax.random.split(key)
    x = jax.random.normal(k_x, (B, S, D), dtype=jnp.float32)
    params = init_params(k_p, D, H, O)

    ref = nsnpau_reference(x, params)

    # exact f32 path (single chunk: S divides tc, no ragged tail)
    out = jax.block_until_ready(nsnpau_forward(x, params, compute_dtype=jnp.float32))
    assert out.shape == (B, O)
    assert jnp.allclose(out, ref, atol=1e-4, rtol=1e-4), (out, ref)

    # f32 path with a ragged time-chunking (exercises the masked-tail loop variant)
    out_rag = jax.block_until_ready(
        nsnpau_forward(x, params, compute_dtype=jnp.float32, chunk=5, unroll=2))
    assert jnp.allclose(out_rag, ref, atol=1e-4, rtol=1e-4), (out_rag, ref)

    # bf16 recurrent-matmul + bf16-streamed-xproj path (MXU-native on v6e/v7x);
    # state & elementwise math stay f32
    out_bf16 = jax.block_until_ready(nsnpau_forward(x, params, compute_dtype=jnp.bfloat16))
    assert jnp.allclose(out_bf16, ref, atol=5e-2, rtol=5e-2), (out_bf16, ref)

    print("KERNEL_OK")
</pallas_src>

<mosaic_0001>
module attributes {stable_mosaic.version = 11 : i64} {
  func.func @_nsnpau_chunk_kernel(%arg0: i32, %arg1: memref<8x2x128xf32, #tpu.memory_space<vmem>>, %arg2: memref<64x128xf32, #tpu.memory_space<vmem>>, %arg3: memref<2x32xf32, #tpu.memory_space<vmem>>, %arg4: memref<2x32xf32, #tpu.memory_space<vmem>>, %arg5: memref<2x32xf32, #tpu.memory_space<vmem>>) attributes {dimension_semantics = [#tpu.dimension_semantics<arbitrary>], iteration_bounds = array<i64: 1>, scalar_prefetch = 0 : i64, scratch_operands = 2 : i64, tpu.core_type = #tpu.core_type<tc>, window_params = [{transform_indices = @transform_0, window_bounds = array<i64: 8, 2, 128>}, {pipeline_mode = #tpu.pipeline_mode<synchronous>, transform_indices = @transform_1, window_bounds = array<i64: 64, 128>}, {pipeline_mode = #tpu.pipeline_mode<synchronous>, transform_indices = @transform_2, window_bounds = array<i64: 2, 32>}]} {
    %c0_i32 = arith.constant 0 : i32
    %0 = arith.cmpi eq, %arg0, %c0_i32 : i32
    %1 = arith.extui %0 : i1 to i32
    %c0_i32_0 = arith.constant 0 : i32
    %2 = arith.cmpi ne, %1, %c0_i32_0 : i32
    scf.if %2 {
      %cst_40 = arith.constant 0.000000e+00 : f32
      %172 = vector.broadcast %cst_40 : f32 to vector<2x32xf32>
      %c0_41 = arith.constant 0 : index
      %c0_42 = arith.constant 0 : index
      %173 = vector.load %arg4[%c0_41, %c0_42] : memref<2x32xf32, #tpu.memory_space<vmem>>, vector<2x32xf32>
      tpu.vector_store %arg4[%c0_41, %c0_42], %172 {strides = array<i32>} : memref<2x32xf32, #tpu.memory_space<vmem>>, vector<2x32xf32>,
      %cst_43 = arith.constant 0.000000e+00 : f32
      %174 = vector.broadcast %cst_43 : f32 to vector<2x32xf32>
      %c0_44 = arith.constant 0 : index
      %c0_45 = arith.constant 0 : index
      %175 = vector.load %arg5[%c0_44, %c0_45] : memref<2x32xf32, #tpu.memory_space<vmem>>, vector<2x32xf32>
      tpu.vector_store %arg5[%c0_44, %c0_45], %174 {strides = array<i32>} : memref<2x32xf32, #tpu.memory_space<vmem>>, vector<2x32xf32>,
    } else {
    }
    %c0 = arith.constant 0 : index
    %c0_1 = arith.constant 0 : index
    %3 = vector.load %arg2[%c0, %c0_1] : memref<64x128xf32, #tpu.memory_space<vmem>>, vector<64x128xf32>
    %4 = tpu.iota {dimensions = array<i32: 1>} : vector<1x128xi32>
    %c96_i32 = arith.constant 96 : i32
    %5 = vector.broadcast %c96_i32 : i32 to vector<1x128xi32>
    %6 = arith.cmpi slt, %4, %5 : vector<1x128xi32>
    %cst = arith.constant 5.000000e-01 : f32
    %cst_2 = arith.constant 1.000000e+00 : f32
    %7 = vector.broadcast %cst : f32 to vector<1x128xf32>
    %8 = vector.broadcast %cst_2 : f32 to vector<1x128xf32>
    %9 = arith.select %6, %7, %8 : vector<1x128xi1>, vector<1x128xf32>
    %cst_3 = arith.constant 5.000000e-01 : f32
    %cst_4 = arith.constant 0.000000e+00 : f32
    %10 = vector.broadcast %cst_3 : f32 to vector<1x128xf32>
    %11 = vector.broadcast %cst_4 : f32 to vector<1x128xf32>
    %12 = arith.select %6, %10, %11 : vector<1x128xi1>, vector<1x128xf32>
    %c0_5 = arith.constant 0 : index
    %c0_6 = arith.constant 0 : index
    %13 = vector.load %arg4[%c0_5, %c0_6] : memref<2x32xf32, #tpu.memory_space<vmem>>, vector<2x32xf32>
    %c0_7 = arith.constant 0 : index
    %c0_8 = arith.constant 0 : index
    %14 = vector.load %arg5[%c0_7, %c0_8] : memref<2x32xf32, #tpu.memory_space<vmem>>, vector<2x32xf32>
    %c0_i32_9 = arith.constant 0 : i32
    %15 = tpu.concatenate %13, %14 in 1 : vector<2x32xf32>, vector<2x32xf32> -> vector<2x64xf32>
    %16 = arith.index_cast %c0_i32_9 : i32 to index
    %c0_10 = arith.constant 0 : index
    %c0_11 = arith.constant 0 : index
    %17 = vector.load %arg1[%16, %c0_10, %c0_11] : memref<8x2x128xf32, #tpu.memory_space<vmem>>, vector<1x2x128xf32>
    %18 = vector.shape_cast %17 : vector<1x2x128xf32> to vector<2x128xf32>
    %cst_12 = arith.constant dense<0.000000e+00> : vector<2x128xf32>
    %19 = tpu.matmul %15, %3, %cst_12 {dimension_numbers = #tpu.dot_dimension_numbers<[1], [0], [0], [1], [0, 0, 1, 1], [], []>} : vector<2x64xf32>, vector<64x128xf32>, vector<2x128xf32> -> vector<2x128xf32>
    %20 = arith.addf %18, %19 : vector<2x128xf32>
    %21 = math.tanh %20 : vector<2x128xf32>
    %22 = vector.broadcast %9 : vector<1x128xf32> to vector<2x128xf32>
    %23 = arith.mulf %21, %22 : vector<2x128xf32>
    %24 = vector.broadcast %12 : vector<1x128xf32> to vector<2x128xf32>
    %25 = arith.addf %23, %24 : vector<2x128xf32>
    %26 = vector.extract_strided_slice %25 {offsets = [0, 0], sizes = [2, 32], strides = [1, 1]} : vector<2x128xf32> to vector<2x32xf32>
    %27 = vector.extract_strided_slice %25 {offsets = [0, 32], sizes = [2, 32], strides = [1, 1]} : vector<2x128xf32> to vector<2x32xf32>
    %28 = vector.extract_strided_slice %25 {offsets = [0, 64], sizes = [2, 32], strides = [1, 1]} : vector<2x128xf32> to vector<2x32xf32>
    %29 = vector.extract_strided_slice %25 {offsets = [0, 96], sizes = [2, 32], strides = [1, 1]} : vector<2x128xf32> to vector<2x32xf32>
    %30 = arith.mulf %26, %14 : vector<2x32xf32>
    %31 = arith.mulf %27, %29 : vector<2x32xf32>
    %32 = arith.subf %30, %31 : vector<2x32xf32>
    %33 = arith.mulf %28, %29 : vector<2x32xf32>
    %c1_i32 = arith.constant 1 : i32
    %34 = tpu.concatenate %33, %32 in 1 : vector<2x32xf32>, vector<2x32xf32> -> vector<2x64xf32>
    %35 = arith.index_cast %c1_i32 : i32 to index
    %c0_13 = arith.constant 0 : index
    %c0_14 = arith.constant 0 : index
    %36 = vector.load %arg1[%35, %c0_13, %c0_14] : memref<8x2x128xf32, #tpu.memory_space<vmem>>, vector<1x2x128xf32>
    %37 = vector.shape_cast %36 : vector<1x2x128xf32> to vector<2x128xf32>
    %cst_15 = arith.constant dense<0.000000e+00> : vector<2x128xf32>
    %38 = tpu.matmul %34, %3, %cst_15 {dimension_numbers = #tpu.dot_dimension_numbers<[1], [0], [0], [1], [0, 0, 1, 1], [], []>} : vector<2x64xf32>, vector<64x128xf32>, vector<2x128xf32> -> vector<2x128xf32>
    %39 = arith.addf %37, %38 : vector<2x128xf32>
    %40 = math.tanh %39 : vector<2x128xf32>
    %41 = vector.broadcast %9 : vector<1x128xf32> to vector<2x128xf32>
    %42 = arith.mulf %40, %41 : vector<2x128xf32>
    %43 = vector.broadcast %12 : vector<1x128xf32> to vector<2x128xf32>
    %44 = arith.addf %42, %43 : vector<2x128xf32>
    %45 = vector.extract_strided_slice %44 {offsets = [0, 0], sizes = [2, 32], strides = [1, 1]} : vector<2x128xf32> to vector<2x32xf32>
    %46 = vector.extract_strided_slice %44 {offsets = [0, 32], sizes = [2, 32], strides = [1, 1]} : vector<2x128xf32> to vector<2x32xf32>
    %47 = vector.extract_strided_slice %44 {offsets = [0, 64], sizes = [2, 32], strides = [1, 1]} : vector<2x128xf32> to vector<2x32xf32>
    %48 = vector.extract_strided_slice %44 {offsets = [0, 96], sizes = [2, 32], strides = [1, 1]} : vector<2x128xf32> to vector<2x32xf32>
    %49 = arith.mulf %45, %32 : vector<2x32xf32>
    %50 = arith.mulf %46, %48 : vector<2x32xf32>
    %51 = arith.subf %49, %50 : vector<2x32xf32>
    %52 = arith.mulf %47, %48 : vector<2x32xf32>
    %c2_i32 = arith.constant 2 : i32
    %53 = tpu.concatenate %52, %51 in 1 : vector<2x32xf32>, vector<2x32xf32> -> vector<2x64xf32>
    %54 = arith.index_cast %c2_i32 : i32 to index
    %c0_16 = arith.constant 0 : index
    %c0_17 = arith.constant 0 : index
    %55 = vector.load %arg1[%54, %c0_16, %c0_17] : memref<8x2x128xf32, #tpu.memory_space<vmem>>, vector<1x2x128xf32>
    %56 = vector.shape_cast %55 : vector<1x2x128xf32> to vector<2x128xf32>
    %cst_18 = arith.constant dense<0.000000e+00> : vector<2x128xf32>
    %57 = tpu.matmul %53, %3, %cst_18 {dimension_numbers = #tpu.dot_dimension_numbers<[1], [0], [0], [1], [0, 0, 1, 1], [], []>} : vector<2x64xf32>, vector<64x128xf32>, vector<2x128xf32> -> vector<2x128xf32>
    %58 = arith.addf %56, %57 : vector<2x128xf32>
    %59 = math.tanh %58 : vector<2x128xf32>
    %60 = vector.broadcast %9 : vector<1x128xf32> to vector<2x128xf32>
    %61 = arith.mulf %59, %60 : vector<2x128xf32>
    %62 = vector.broadcast %12 : vector<1x128xf32> to vector<2x128xf32>
    %63 = arith.addf %61, %62 : vector<2x128xf32>
    %64 = vector.extract_strided_slice %63 {offsets = [0, 0], sizes = [2, 32], strides = [1, 1]} : vector<2x128xf32> to vector<2x32xf32>
    %65 = vector.extract_strided_slice %63 {offsets = [0, 32], sizes = [2, 32], strides = [1, 1]} : vector<2x128xf32> to vector<2x32xf32>
    %66 = vector.extract_strided_slice %63 {offsets = [0, 64], sizes = [2, 32], strides = [1, 1]} : vector<2x128xf32> to vector<2x32xf32>
    %67 = vector.extract_strided_slice %63 {offsets = [0, 96], sizes = [2, 32], strides = [1, 1]} : vector<2x128xf32> to vector<2x32xf32>
    %68 = arith.mulf %64, %51 : vector<2x32xf32>
    %69 = arith.mulf %65, %67 : vector<2x32xf32>
    %70 = arith.subf %68, %69 : vector<2x32xf32>
    %71 = arith.mulf %66, %67 : vector<2x32xf32>
    %c3_i32 = arith.constant 3 : i32
    %72 = tpu.concatenate %71, %70 in 1 : vector<2x32xf32>, vector<2x32xf32> -> vector<2x64xf32>
    %73 = arith.index_cast %c3_i32 : i32 to index
    %c0_19 = arith.constant 0 : index
    %c0_20 = arith.constant 0 : index
    %74 = vector.load %arg1[%73, %c0_19, %c0_20] : memref<8x2x128xf32, #tpu.memory_space<vmem>>, vector<1x2x128xf32>
    %75 = vector.shape_cast %74 : vector<1x2x128xf32> to vector<2x128xf32>
    %cst_21 = arith.constant dense<0.000000e+00> : vector<2x128xf32>
    %76 = tpu.matmul %72, %3, %cst_21 {dimension_numbers = #tpu.dot_dimension_numbers<[1], [0], [0], [1], [0, 0, 1, 1], [], []>} : vector<2x64xf32>, vector<64x128xf32>, vector<2x128xf32> -> vector<2x128xf32>
    %77 = arith.addf %75, %76 : vector<2x128xf32>
    %78 = math.tanh %77 : vector<2x128xf32>
    %79 = vector.broadcast %9 : vector<1x128xf32> to vector<2x128xf32>
    %80 = arith.mulf %78, %79 : vector<2x128xf32>
    %81 = vector.broadcast %12 : vector<1x128xf32> to vector<2x128xf32>
    %82 = arith.addf %80, %81 : vector<2x128xf32>
    %83 = vector.extract_strided_slice %82 {offsets = [0, 0], sizes = [2, 32], strides = [1, 1]} : vector<2x128xf32> to vector<2x32xf32>
    %84 = vector.extract_strided_slice %82 {offsets = [0, 32], sizes = [2, 32], strides = [1, 1]} : vector<2x128xf32> to vector<2x32xf32>
    %85 = vector.extract_strided_slice %82 {offsets = [0, 64], sizes = [2, 32], strides = [1, 1]} : vector<2x128xf32> to vector<2x32xf32>
    %86 = vector.extract_strided_slice %82 {offsets = [0, 96], sizes = [2, 32], strides = [1, 1]} : vector<2x128xf32> to vector<2x32xf32>
    %87 = arith.mulf %83, %70 : vector<2x32xf32>
    %88 = arith.mulf %84, %86 : vector<2x32xf32>
    %89 = arith.subf %87, %88 : vector<2x32xf32>
    %90 = arith.mulf %85, %86 : vector<2x32xf32>
    %c4_i32 = arith.constant 4 : i32
    %91 = tpu.concatenate %90, %89 in 1 : vector<2x32xf32>, vector<2x32xf32> -> vector<2x64xf32>
    %92 = arith.index_cast %c4_i32 : i32 to index
    %c0_22 = arith.constant 0 : index
    %c0_23 = arith.constant 0 : index
    %93 = vector.load %arg1[%92, %c0_22, %c0_23] : memref<8x2x128xf32, #tpu.memory_space<vmem>>, vector<1x2x128xf32>
    %94 = vector.shape_cast %93 : vector<1x2x128xf32> to vector<2x128xf32>
    %cst_24 = arith.constant dense<0.000000e+00> : vector<2x128xf32>
    %95 = tpu.matmul %91, %3, %cst_24 {dimension_numbers = #tpu.dot_dimension_numbers<[1], [0], [0], [1], [0, 0, 1, 1], [], []>} : vector<2x64xf32>, vector<64x128xf32>, vector<2x128xf32> -> vector<2x128xf32>
    %96 = arith.addf %94, %95 : vector<2x128xf32>
    %97 = math.tanh %96 : vector<2x128xf32>
    %98 = vector.broadcast %9 : vector<1x128xf32> to vector<2x128xf32>
    %99 = arith.mulf %97, %98 : vector<2x128xf32>
    %100 = vector.broadcast %12 : vector<1x128xf32> to vector<2x128xf32>
    %101 = arith.addf %99, %100 : vector<2x128xf32>
    %102 = vector.extract_strided_slice %101 {offsets = [0, 0], sizes = [2, 32], strides = [1, 1]} : vector<2x128xf32> to vector<2x32xf32>
    %103 = vector.extract_strided_slice %101 {offsets = [0, 32], sizes = [2, 32], strides = [1, 1]} : vector<2x128xf32> to vector<2x32xf32>
    %104 = vector.extract_strided_slice %101 {offsets = [0, 64], sizes = [2, 32], strides = [1, 1]} : vector<2x128xf32> to vector<2x32xf32>
    %105 = vector.extract_strided_slice %101 {offsets = [0, 96], sizes = [2, 32], strides = [1, 1]} : vector<2x128xf32> to vector<2x32xf32>
    %106 = arith.mulf %102, %89 : vector<2x32xf32>
    %107 = arith.mulf %103, %105 : vector<2x32xf32>
    %108 = arith.subf %106, %107 : vector<2x32xf32>
    %109 = arith.mulf %104, %105 : vector<2x32xf32>
    %c5_i32 = arith.constant 5 : i32
    %110 = tpu.concatenate %109, %108 in 1 : vector<2x32xf32>, vector<2x32xf32> -> vector<2x64xf32>
    %111 = arith.index_cast %c5_i32 : i32 to index
    %c0_25 = arith.constant 0 : index
    %c0_26 = arith.constant 0 : index
    %112 = vector.load %arg1[%111, %c0_25, %c0_26] : memref<8x2x128xf32, #tpu.memory_space<vmem>>, vector<1x2x128xf32>
    %113 = vector.shape_cast %112 : vector<1x2x128xf32> to vector<2x128xf32>
    %cst_27 = arith.constant dense<0.000000e+00> : vector<2x128xf32>
    %114 = tpu.matmul %110, %3, %cst_27 {dimension_numbers = #tpu.dot_dimension_numbers<[1], [0], [0], [1], [0, 0, 1, 1], [], []>} : vector<2x64xf32>, vector<64x128xf32>, vector<2x128xf32> -> vector<2x128xf32>
    %115 = arith.addf %113, %114 : vector<2x128xf32>
    %116 = math.tanh %115 : vector<2x128xf32>
    %117 = vector.broadcast %9 : vector<1x128xf32> to vector<2x128xf32>
    %118 = arith.mulf %116, %117 : vector<2x128xf32>
    %119 = vector.broadcast %12 : vector<1x128xf32> to vector<2x128xf32>
    %120 = arith.addf %118, %119 : vector<2x128xf32>
    %121 = vector.extract_strided_slice %120 {offsets = [0, 0], sizes = [2, 32], strides = [1, 1]} : vector<2x128xf32> to vector<2x32xf32>
    %122 = vector.extract_strided_slice %120 {offsets = [0, 32], sizes = [2, 32], strides = [1, 1]} : vector<2x128xf32> to vector<2x32xf32>
    %123 = vector.extract_strided_slice %120 {offsets = [0, 64], sizes = [2, 32], strides = [1, 1]} : vector<2x128xf32> to vector<2x32xf32>
    %124 = vector.extract_strided_slice %120 {offsets = [0, 96], sizes = [2, 32], strides = [1, 1]} : vector<2x128xf32> to vector<2x32xf32>
    %125 = arith.mulf %121, %108 : vector<2x32xf32>
    %126 = arith.mulf %122, %124 : vector<2x32xf32>
    %127 = arith.subf %125, %126 : vector<2x32xf32>
    %128 = arith.mulf %123, %124 : vector<2x32xf32>
    %c6_i32 = arith.constant 6 : i32
    %129 = tpu.concatenate %128, %127 in 1 : vector<2x32xf32>, vector<2x32xf32> -> vector<2x64xf32>
    %130 = arith.index_cast %c6_i32 : i32 to index
    %c0_28 = arith.constant 0 : index
    %c0_29 = arith.constant 0 : index
    %131 = vector.load %arg1[%130, %c0_28, %c0_29] : memref<8x2x128xf32, #tpu.memory_space<vmem>>, vector<1x2x128xf32>
    %132 = vector.shape_cast %131 : vector<1x2x128xf32> to vector<2x128xf32>
    %cst_30 = arith.constant dense<0.000000e+00> : vector<2x128xf32>
    %133 = tpu.matmul %129, %3, %cst_30 {dimension_numbers = #tpu.dot_dimension_numbers<[1], [0], [0], [1], [0, 0, 1, 1], [], []>} : vector<2x64xf32>, vector<64x128xf32>, vector<2x128xf32> -> vector<2x128xf32>
    %134 = arith.addf %132, %133 : vector<2x128xf32>
    %135 = math.tanh %134 : vector<2x128xf32>
    %136 = vector.broadcast %9 : vector<1x128xf32> to vector<2x128xf32>
    %137 = arith.mulf %135, %136 : vector<2x128xf32>
    %138 = vector.broadcast %12 : vector<1x128xf32> to vector<2x128xf32>
    %139 = arith.addf %137, %138 : vector<2x128xf32>
    %140 = vector.extract_strided_slice %139 {offsets = [0, 0], sizes = [2, 32], strides = [1, 1]} : vector<2x128xf32> to vector<2x32xf32>
    %141 = vector.extract_strided_slice %139 {offsets = [0, 32], sizes = [2, 32], strides = [1, 1]} : vector<2x128xf32> to vector<2x32xf32>
    %142 = vector.extract_strided_slice %139 {offsets = [0, 64], sizes = [2, 32], strides = [1, 1]} : vector<2x128xf32> to vector<2x32xf32>
    %143 = vector.extract_strided_slice %139 {offsets = [0, 96], sizes = [2, 32], strides = [1, 1]} : vector<2x128xf32> to vector<2x32xf32>
    %144 = arith.mulf %140, %127 : vector<2x32xf32>
    %145 = arith.mulf %141, %143 : vector<2x32xf32>
    %146 = arith.subf %144, %145 : vector<2x32xf32>
    %147 = arith.mulf %142, %143 : vector<2x32xf32>
    %c7_i32 = arith.constant 7 : i32
    %148 = tpu.concatenate %147, %146 in 1 : vector<2x32xf32>, vector<2x32xf32> -> vector<2x64xf32>
    %149 = arith.index_cast %c7_i32 : i32 to index
    %c0_31 = arith.constant 0 : index
    %c0_32 = arith.constant 0 : index
    %150 = vector.load %arg1[%149, %c0_31, %c0_32] : memref<8x2x128xf32, #tpu.memory_space<vmem>>, vector<1x2x128xf32>
    %151 = vector.shape_cast %150 : vector<1x2x128xf32> to vector<2x128xf32>
    %cst_33 = arith.constant dense<0.000000e+00> : vector<2x128xf32>
    %152 = tpu.matmul %148, %3, %cst_33 {dimension_numbers = #tpu.dot_dimension_numbers<[1], [0], [0], [1], [0, 0, 1, 1], [], []>} : vector<2x64xf32>, vector<64x128xf32>, vector<2x128xf32> -> vector<2x128xf32>
    %153 = arith.addf %151, %152 : vector<2x128xf32>
    %154 = math.tanh %153 : vector<2x128xf32>
    %155 = vector.broadcast %9 : vector<1x128xf32> to vector<2x128xf32>
    %156 = arith.mulf %154, %155 : vector<2x128xf32>
    %157 = vector.broadcast %12 : vector<1x128xf32> to vector<2x128xf32>
    %158 = arith.addf %156, %157 : vector<2x128xf32>
    %159 = vector.extract_strided_slice %158 {offsets = [0, 0], sizes = [2, 32], strides = [1, 1]} : vector<2x128xf32> to vector<2x32xf32>
    %160 = vector.extract_strided_slice %158 {offsets = [0, 32], sizes = [2, 32], strides = [1, 1]} : vector<2x128xf32> to vector<2x32xf32>
    %161 = vector.extract_strided_slice %158 {offsets = [0, 64], sizes = [2, 32], strides = [1, 1]} : vector<2x128xf32> to vector<2x32xf32>
    %162 = vector.extract_strided_slice %158 {offsets = [0, 96], sizes = [2, 32], strides = [1, 1]} : vector<2x128xf32> to vector<2x32xf32>
    %163 = arith.mulf %159, %146 : vector<2x32xf32>
    %164 = arith.mulf %160, %162 : vector<2x32xf32>
    %165 = arith.subf %163, %164 : vector<2x32xf32>
    %166 = arith.mulf %161, %162 : vector<2x32xf32>
    %c8_i32 = arith.constant 8 : i32
    %c0_34 = arith.constant 0 : index
    %c0_35 = arith.constant 0 : index
    %167 = vector.load %arg4[%c0_34, %c0_35] : memref<2x32xf32, #tpu.memory_space<vmem>>, vector<2x32xf32>
    tpu.vector_store %arg4[%c0_34, %c0_35], %166 {strides = array<i32>} : memref<2x32xf32, #tpu.memory_space<vmem>>, vector<2x32xf32>,
    %c0_36 = arith.constant 0 : index
    %c0_37 = arith.constant 0 : index
    %168 = vector.load %arg5[%c0_36, %c0_37] : memref<2x32xf32, #tpu.memory_space<vmem>>, vector<2x32xf32>
    tpu.vector_store %arg5[%c0_36, %c0_37], %165 {strides = array<i32>} : memref<2x32xf32, #tpu.memory_space<vmem>>, vector<2x32xf32>,
    %c0_i32_38 = arith.constant 0 : i32
    %169 = arith.cmpi eq, %arg0, %c0_i32_38 : i32
    %170 = arith.extui %169 : i1 to i32
    %c0_i32_39 = arith.constant 0 : i32
    %171 = arith.cmpi ne, %170, %c0_i32_39 : i32
    scf.if %171 {
      %c0_40 = arith.constant 0 : index
      %c0_41 = arith.constant 0 : index
      %172 = vector.load %arg4[%c0_40, %c0_41] : memref<2x32xf32, #tpu.memory_space<vmem>>, vector<2x32xf32>
      %c0_42 = arith.constant 0 : index
      %c0_43 = arith.constant 0 : index
      %173 = vector.load %arg3[%c0_42, %c0_43] : memref<2x32xf32, #tpu.memory_space<vmem>>, vector<2x32xf32>
      tpu.vector_store %arg3[%c0_42, %c0_43], %172 {strides = array<i32>} : memref<2x32xf32, #tpu.memory_space<vmem>>, vector<2x32xf32>,
    } else {
    }
    return
  }
  func.func @transform_0(%arg0: i32) -> (i32, i32, i32) {
    %c0_i32 = arith.constant 0 : i32
    %c0_i32_0 = arith.constant 0 : i32
    %c0_i32_1 = arith.constant 0 : i32
    return %arg0, %c0_i32, %c0_i32_0 : i32, i32, i32
  }
  func.func @transform_1(%arg0: i32) -> (i32, i32) {
    %c0_i32 = arith.constant 0 : i32
    %c0_i32_0 = arith.constant 0 : i32
    %c0_i32_1 = arith.constant 0 : i32
    return %c0_i32, %c0_i32_0 : i32, i32
  }
  func.func @transform_2(%arg0: i32) -> (i32, i32) {
    %c0_i32 = arith.constant 0 : i32
    %c0_i32_0 = arith.constant 0 : i32
    %c0_i32_1 = arith.constant 0 : i32
    return %c0_i32, %c0_i32_0 : i32, i32
  }
}

</mosaic_0001>

<bundles_post_ra>
// kernel: tpu_custom_call.1
= control target key start
LH: loop header
LB: loop body
LE: loop exit
PB: predicated region body
PF: predicated region fallthrough
CT: control target
= control target key end

     0   :  { %7 = vsyncpa [#allocation5], 0  ;;  %s755_s0 = inlined_call_operand.hbm [shape: f32[8,2,128], index: 0, kind: input, shape index: {}]   ;;  %s756_s1 = inlined_call_operand.hbm [shape: f32[64,128], index: 1, kind: input, shape index: {}]   ;;  %s757_s2 = inlined_call_operand.hbm [shape: f32[2,32], index: 2, kind: output, shape index: {}]  }
   0x1   :  { %8 = vsyncpa [#allocation8], 0 }
   0x2   :  { %9 = vsyncpa [#allocation6], 0  ;;  %s14_s11 = sshll.u32 %s755_s0, 4  ;;  %s630_s12 = smov [#allocation4]   ;;  %s15_s11 = int_to_ptr.hbm [resolvable:$true] %s14_s11 }
   0x3   :  { %s16_s13 = sshll.u32 %s630_s12, 4  ;;  %s27_s16 = sshll.u32 %s756_s1, 4  ;;  %s17_s13 = int_to_ptr.vmem [resolvable:$true] %s16_s13  ;;  %s28_s16 = int_to_ptr.hbm [resolvable:$true] %s27_s16 }
   0x4   :  { %s631_s17 = smov 32   ;;  %s632_s18 = smov 2  }
   0x5   :  { %22 = dma.hbm_to_vmem [thread:$0]  %s15_s11, 256, %s17_s13, [#allocation5], %s631_s17, %s631_s17, %s632_s18  }
   0x6   :  { %s633_s19 = smov [#allocation7]   ;;  %s634_s21 = smov 128  }
   0x7   :  { %s29_s20 = sshll.u32 %s633_s19, 4  ;;  %s635_s22 = smov 8   ;;  %s30_s20 = int_to_ptr.vmem [resolvable:$true] %s29_s20 }
   0x8   :  { %35 = dma.hbm_to_vmem [thread:$0]  %s28_s16, 1024, %s30_s20, [#allocation8], %s634_s21, %s634_s21, %s635_s22  }
   0x9   :  { %624 = dma.done.wait [#allocation5], 256  }
   0xa   :  { %625 = vsyncadd [#allocation5], 4294967040 }
   0xb   :  { %626 = dma.done.wait [#allocation8], 1024  }
   0xc   :  { %627 = vsyncadd [#allocation8], 4294966272  ;;  %vm48_vm0 = vcmask 254976   ;;  %v636_v0 = vmov 0.0   ;;  %v58_v1 = vld [vmem:[#allocation7 + $0x38] sm:$0xff]  ;;  %v57_v2 = vld [vmem:[#allocation7 + $0x30] sm:$0xff]  ;;  %v59_v13 = vlaneseq }
   0xd   :  { %50 = vst.msk [vmem:[#allocation3] sm:$0x3] %vm48_vm0, %v636_v0  ;;  %85 = vmatpush.msra.mxu0 %v58_v1  ;;  %138 = vmatpush.msra.mxu1 %v58_v1  ;;  %v56_v4 = vld [vmem:[#allocation7 + $0x28] sm:$0xff]  ;;  %v55_v5 = vld [vmem:[#allocation7 + $0x20] sm:$0xff]  ;;  %v54_v6 = vld [vmem:[#allocation7 + $0x18] sm:$0xff]  ;;  %vm70_vm1 = vcmask 261120  }
   0xe   :  { %49 = vst.msk [vmem:[#allocation2] sm:$0x3] %vm48_vm0, %v636_v0  ;;  %191 = vmatpush.msra.mxu2 %v58_v1  ;;  %244 = vmatpush.msra.mxu3 %v58_v1  ;;  %v53_v7 = vld [vmem:[#allocation7 + $0x10] sm:$0xff]  ;;  %v52_v8 = vld [vmem:[#allocation7 + $0x8] sm:$0xff]  ;;  %v51_v9 = vld [vmem:[#allocation7] sm:$0xff]  ;;  %vm73_vm2 = vcmask 523264  }
   0xf   :  { %86 = vmatpush.msra.mxu0 %v57_v2  ;;  %139 = vmatpush.msra.mxu1 %v57_v2  ;;  %v72_v14 = vld [vmem:[#allocation4] sm:$0x3]  ;;  %v60_v15 = vand.u32 127, %v59_v13  ;;  %v637_v18 = vmov 1.0   ;;  %s638_s0 = smov 64   ;;  %s639_s1 = smov 96  }
  0x10   :  { %192 = vmatpush.msra.mxu2 %v57_v2  ;;  %245 = vmatpush.msra.mxu3 %v57_v2  ;;  %v126_v34 = vld [vmem:[#allocation4 + $0x2] sm:$0x3]  ;;  %v179_v50 = vld [vmem:[#allocation4 + $0x4] sm:$0x3]  ;;  %s640_s23 = smov [#allocation9]   ;;  %s506_s27 = sshll.u32 %s757_s2, 4  ;;  %s507_s27 = int_to_ptr.hbm [resolvable:$true] %s506_s27 }
  0x11   :  { %87 = vmatpush.msra.mxu0 %v56_v4  ;;  %140 = vmatpush.msra.mxu1 %v56_v4  ;;  %vm61_vm3 = vcmp.lt.s32.totalorder %v60_v15, 96  ;;  %s504_s24 = sshll.u32 %s640_s23, 4  ;;  %s505_s24 = int_to_ptr.vmem [resolvable:$true] %s504_s24 }
  0x12   :  { %193 = vmatpush.msra.mxu2 %v56_v4  ;;  %246 = vmatpush.msra.mxu3 %v56_v4  ;;  %v674_v19 = vsel %vm61_vm3, 0.5, %v637_v18  ;;  %v677_v21 = vsel %vm61_vm3, 0.5, %v636_v0  ;;  %v285_v18 = vld [vmem:[#allocation4 + $0x8] sm:$0x3] }
  0x13   :  { %88 = vmatpush.msra.mxu0 %v55_v5  ;;  %141 = vmatpush.msra.mxu1 %v55_v5 }
  0x14   :  { %v668_v3 = vld [vmem:[#allocation3] sm:$0x3]  ;;  %194 = vmatpush.msra.mxu2 %v55_v5  ;;  %247 = vmatpush.msra.mxu3 %v55_v5 }
  0x15   :  { %67 = vrot.lane.b32.xlu0 %v668_v3, %s631_s17  ;;  %89 = vmatpush.msra.mxu0 %v54_v6  ;;  %v64_v10 = vld [vmem:[#allocation2] sm:$0x3] }
  0x16   :  { %142 = vmatpush.msra.mxu1 %v54_v6  ;;  %195 = vmatpush.msra.mxu2 %v54_v6 }
  0x17   :  { %90 = vmatpush.msra.mxu0 %v53_v7  ;;  %248 = vmatpush.msra.mxu3 %v54_v6 }
  0x18   :  { %143 = vmatpush.msra.mxu1 %v53_v7  ;;  %196 = vmatpush.msra.mxu2 %v53_v7 }
  0x19   :  { %91 = vmatpush.msra.mxu0 %v52_v8  ;;  %249 = vmatpush.msra.mxu3 %v53_v7 }
  0x1a   :  { %144 = vmatpush.msra.mxu1 %v52_v8  ;;  %197 = vmatpush.msra.mxu2 %v52_v8 }
  0x1b   :  { %250 = vmatpush.msra.mxu3 %v52_v8  ;;  %92 = vmatpush.msra.mxu0 %v51_v9 }
  0x1c   :  { %145 = vmatpush.msra.mxu1 %v51_v9  ;;  %198 = vmatpush.msra.mxu2 %v51_v9 }
  0x1d   :  { %251 = vmatpush.msra.mxu3 %v51_v9  ;;  %297 = vmatpush.msrb.mxu0 %v58_v1 }
  0x1e   :  { %350 = vmatpush.msrb.mxu1 %v58_v1  ;;  %403 = vmatpush.msrb.mxu2 %v58_v1 }
  0x1f   :  { %456 = vmatpush.msrb.mxu3 %v58_v1  ;;  %298 = vmatpush.msrb.mxu0 %v57_v2 }
  0x20   :  { %351 = vmatpush.msrb.mxu1 %v57_v2  ;;  %404 = vmatpush.msrb.mxu2 %v57_v2 }
  0x21   :  { %457 = vmatpush.msrb.mxu3 %v57_v2  ;;  %299 = vmatpush.msrb.mxu0 %v56_v4  ;;  %v232_v2 = vld [vmem:[#allocation4 + $0x6] sm:$0x3] }
  0x22   :  { %352 = vmatpush.msrb.mxu1 %v56_v4  ;;  %405 = vmatpush.msrb.mxu2 %v56_v4 }
  0x23   :  { %458 = vmatpush.msrb.mxu3 %v56_v4  ;;  %300 = vmatpush.msrb.mxu0 %v55_v5 }
  0x24   :  { %353 = vmatpush.msrb.mxu1 %v55_v5  ;;  %406 = vmatpush.msrb.mxu2 %v55_v5 }
  0x25   :  { %459 = vmatpush.msrb.mxu3 %v55_v5  ;;  %301 = vmatpush.msrb.mxu0 %v54_v6 }
  0x26   :  { %354 = vmatpush.msrb.mxu1 %v54_v6  ;;  %407 = vmatpush.msrb.mxu2 %v54_v6 }
  0x27   :  { %460 = vmatpush.msrb.mxu3 %v54_v6  ;;  %302 = vmatpush.msrb.mxu0 %v53_v7 }
  0x28   :  { %355 = vmatpush.msrb.mxu1 %v53_v7  ;;  %408 = vmatpush.msrb.mxu2 %v53_v7 }
  0x29   :  { %461 = vmatpush.msrb.mxu3 %v53_v7  ;;  %303 = vmatpush.msrb.mxu0 %v52_v8 }
  0x2a   :  { %356 = vmatpush.msrb.mxu1 %v52_v8  ;;  %409 = vmatpush.msrb.mxu2 %v52_v8 }
  0x2b   :  { %462 = vmatpush.msrb.mxu3 %v52_v8  ;;  %304 = vmatpush.msrb.mxu0 %v51_v9 }
  0x2c   :  { %357 = vmatpush.msrb.mxu1 %v51_v9  ;;  %410 = vmatpush.msrb.mxu2 %v51_v9 }
  0x2d   :  { %463 = vmatpush.msrb.mxu3 %v51_v9 }
  0x87   :  { %v68_v11 = vpop.permute.xlu0 %67 }
  0x88   :  { %v71_v12 = vsel %vm70_vm1, %v64_v10, %v68_v11 }
  0x89   :  { %517 = vmatmul.msk.f32.vlgmr.msra.gmra.mxu0 %vm73_vm2, %v71_v12 }
 0x106   :  { %v94_v16 = vpop.f32.mrf.mxu0 }
 0x107   :  { %v97_v17 = vadd.f32 %v94_v16, %v72_v14 }
 0x109   :  { %536 = vtanh.f32 %v97_v17 }
 0x10f   :  { %v537_v20 = vpop.eup %536 }
 0x110   :  { %v99_v22 = vmul.f32 %v537_v20, %v674_v19 }
 0x112   :  { %v100_v23 = vadd.f32 %v99_v22, %v677_v21 }
 0x114   :  { %103 = vrot.lane.b32.xlu0 %v100_v23, %s638_s0  ;;  %v101_v29 = vmul.f32 %v100_v23, %v668_v3 }
 0x186   :  { %v104_v24 = vpop.permute.xlu0 %103 }
 0x187   :  { %v106_v25 = vmul.f32 %v104_v24, %v100_v23 }
 0x189   :  { %108 = vrot.lane.b32.xlu1 %v106_v25, %s639_s1 }
 0x191   :  { %112 = vrot.lane.b32.xlu1 %v100_v23, %s639_s1 }
 0x1fb   :  { %v109_v26 = vpop.permute.xlu1 %108 }
 0x1fc   :  { %v111_v30 = vsub.f32 %v101_v29, %v109_v26 }
 0x203   :  { %v113_v27 = vpop.permute.xlu1 %112 }
 0x204   :  { %v115_v28 = vmul.f32 %v113_v27, %v100_v23 }
 0x206   :  { %117 = vrot.lane.b32.xlu2 %v115_v28, %s638_s0 }
 0x20e   :  { %121 = vrot.lane.b32.xlu2 %v111_v30, %s631_s17 }
 0x260   :  { %v118_v31 = vpop.permute.xlu2 %117 }
 0x268   :  { %v122_v32 = vpop.permute.xlu2 %121 }
 0x269   :  { %v124_v33 = vsel %vm70_vm1, %v118_v31, %v122_v32 }
 0x26a   :  { %518 = vmatmul.msk.f32.vlgmr.msra.gmra.mxu1 %vm73_vm2, %v124_v33 }
 0x2e7   :  { %v147_v35 = vpop.f32.mrf.mxu1 }
 0x2e8   :  { %v150_v36 = vadd.f32 %v147_v35, %v126_v34 }
 0x2ea   :  { %538 = vtanh.f32 %v150_v36  ;;  %v338_v36 = vld [vmem:[#allocation4 + $0xa] sm:$0x3] }
 0x2f0   :  { %v539_v37 = vpop.eup %538 }
 0x2f1   :  { %v152_v38 = vmul.f32 %v539_v37, %v674_v19 }
 0x2f3   :  { %v153_v39 = vadd.f32 %v152_v38, %v677_v21 }
 0x2f5   :  { %165 = vrot.lane.b32.xlu2 %v153_v39, %s639_s1  ;;  %156 = vrot.lane.b32.xlu0 %v153_v39, %s638_s0  ;;  %v154_v44 = vmul.f32 %v153_v39, %v111_v30 }
 0x34f   :  { %v166_v40 = vpop.permute.xlu2 %165 }
 0x350   :  { %v168_v41 = vmul.f32 %v166_v40, %v153_v39 }
 0x352   :  { %170 = vrot.lane.b32.xlu0 %v168_v41, %s638_s0 }
 0x367   :  { %v157_v42 = vpop.permute.xlu0 %156 }
 0x368   :  { %v159_v43 = vmul.f32 %v157_v42, %v153_v39 }
 0x36a   :  { %161 = vrot.lane.b32.xlu1 %v159_v43, %s639_s1 }
 0x3c4   :  { %v171_v47 = vpop.permute.xlu0 %170 }
 0x3dc   :  { %v162_v45 = vpop.permute.xlu1 %161 }
 0x3dd   :  { %v164_v46 = vsub.f32 %v154_v44, %v162_v45 }
 0x3df   :  { %174 = vrot.lane.b32.xlu1 %v164_v46, %s631_s17 }
 0x451   :  { %v175_v48 = vpop.permute.xlu1 %174 }
 0x452   :  { %v177_v49 = vsel %vm70_vm1, %v171_v47, %v175_v48 }
 0x453   :  { %519 = vmatmul.msk.f32.vlgmr.msra.gmra.mxu2 %vm73_vm2, %v177_v49 }
 0x4d6   :  { %v200_v51 = vpop.f32.mrf.mxu2 }
 0x4d7   :  { %v203_v52 = vadd.f32 %v200_v51, %v179_v50 }
 0x4d9   :  { %540 = vtanh.f32 %v203_v52  ;;  %v391_v52 = vld [vmem:[#allocation4 + $0xc] sm:$0x3] }
 0x4df   :  { %v541_v53 = vpop.eup %540 }
 0x4e0   :  { %v205_v54 = vmul.f32 %v541_v53, %v674_v19 }
 0x4e2   :  { %v206_v55 = vadd.f32 %v205_v54, %v677_v21 }
 0x4e4   :  { %218 = vrot.lane.b32.xlu1 %v206_v55, %s639_s1  ;;  %209 = vrot.lane.b32.xlu2 %v206_v55, %s638_s0  ;;  %v207_v60 = vmul.f32 %v206_v55, %v164_v46 }
 0x53e   :  { %v210_v56 = vpop.permute.xlu2 %209 }
 0x53f   :  { %v212_v57 = vmul.f32 %v210_v56, %v206_v55 }
 0x541   :  { %214 = vrot.lane.b32.xlu0 %v212_v57, %s639_s1 }
 0x556   :  { %v219_v58 = vpop.permute.xlu1 %218 }
 0x557   :  { %v221_v59 = vmul.f32 %v219_v58, %v206_v55 }
 0x559   :  { %223 = vrot.lane.b32.xlu2 %v221_v59, %s638_s0 }
 0x5b3   :  { %v215_v61 = vpop.permute.xlu0 %214  ;;  %v224_v63 = vpop.permute.xlu2 %223 }
 0x5b4   :  { %v217_v62 = vsub.f32 %v207_v60, %v215_v61 }
 0x5b6   :  { %227 = vrot.lane.b32.xlu0 %v217_v62, %s631_s17 }
 0x628   :  { %v228_v0 = vpop.permute.xlu0 %227 }
 0x629   :  { %v230_v1 = vsel %vm70_vm1, %v224_v63, %v228_v0 }
 0x62a   :  { %520 = vmatmul.msk.f32.vlgmr.msra.gmra.mxu3 %vm73_vm2, %v230_v1 }
 0x6ad   :  { %v253_v3 = vpop.f32.mrf.mxu3 }
 0x6ae   :  { %v256_v4 = vadd.f32 %v253_v3, %v232_v2 }
 0x6b0   :  { %542 = vtanh.f32 %v256_v4  ;;  %v444_v4 = vld [vmem:[#allocation4 + $0xe] sm:$0x3] }
 0x6b6   :  { %v543_v5 = vpop.eup %542 }
 0x6b7   :  { %v258_v6 = vmul.f32 %v543_v5, %v674_v19 }
 0x6b9   :  { %v259_v7 = vadd.f32 %v258_v6, %v677_v21 }
 0x6bb   :  { %271 = vrot.lane.b32.xlu0 %v259_v7, %s639_s1  ;;  %262 = vrot.lane.b32.xlu1 %v259_v7, %s638_s0  ;;  %v260_v12 = vmul.f32 %v259_v7, %v217_v62 }
 0x72d   :  { %v272_v8 = vpop.permute.xlu0 %271  ;;  %v263_v9 = vpop.permute.xlu1 %262 }
 0x72e   :  { %v274_v10 = vmul.f32 %v272_v8, %v259_v7  ;;  %v265_v11 = vmul.f32 %v263_v9, %v259_v7 }
 0x730   :  { %276 = vrot.lane.b32.xlu1 %v274_v10, %s638_s0  ;;  %267 = vrot.lane.b32.xlu2 %v265_v11, %s639_s1 }
 0x78a   :  { %v268_v13 = vpop.permute.xlu2 %267 }
 0x78b   :  { %v270_v14 = vsub.f32 %v260_v12, %v268_v13 }
 0x78d   :  { %280 = vrot.lane.b32.xlu2 %v270_v14, %s631_s17 }
 0x7a2   :  { %v277_v15 = vpop.permute.xlu1 %276 }
 0x7e7   :  { %v281_v16 = vpop.permute.xlu2 %280 }
 0x7e8   :  { %v283_v17 = vsel %vm70_vm1, %v277_v15, %v281_v16 }
 0x7e9   :  { %521 = vmatmul.msk.f32.vlgmr.msrb.gmra.mxu0 %vm73_vm2, %v283_v17 }
 0x866   :  { %v306_v20 = vpop.f32.mrf.mxu0 }
 0x867   :  { %v309_v22 = vadd.f32 %v306_v20, %v285_v18 }
 0x869   :  { %544 = vtanh.f32 %v309_v22 }
 0x86f   :  { %v545_v23 = vpop.eup %544 }
 0x870   :  { %v311_v24 = vmul.f32 %v545_v23, %v674_v19 }
 0x872   :  { %v312_v25 = vadd.f32 %v311_v24, %v677_v21 }
 0x874   :  { %324 = vrot.lane.b32.xlu2 %v312_v25, %s639_s1  ;;  %315 = vrot.lane.b32.xlu0 %v312_v25, %s638_s0  ;;  %v313_v30 = vmul.f32 %v312_v25, %v270_v14 }
 0x8ce   :  { %v325_v26 = vpop.permute.xlu2 %324 }
 0x8cf   :  { %v327_v27 = vmul.f32 %v325_v26, %v312_v25 }
 0x8d1   :  { %329 = vrot.lane.b32.xlu0 %v327_v27, %s638_s0 }
 0x8e6   :  { %v316_v28 = vpop.permute.xlu0 %315 }
 0x8e7   :  { %v318_v29 = vmul.f32 %v316_v28, %v312_v25 }
 0x8e9   :  { %320 = vrot.lane.b32.xlu1 %v318_v29, %s639_s1 }
 0x943   :  { %v330_v33 = vpop.permute.xlu0 %329 }
 0x95b   :  { %v321_v31 = vpop.permute.xlu1 %320 }
 0x95c   :  { %v323_v32 = vsub.f32 %v313_v30, %v321_v31 }
 0x95e   :  { %333 = vrot.lane.b32.xlu1 %v323_v32, %s631_s17 }
 0x9d0   :  { %v334_v34 = vpop.permute.xlu1 %333 }
 0x9d1   :  { %v336_v35 = vsel %vm70_vm1, %v330_v33, %v334_v34 }
 0x9d2   :  { %522 = vmatmul.msk.f32.vlgmr.msrb.gmra.mxu1 %vm73_vm2, %v336_v35 }
 0xa4f   :  { %v359_v37 = vpop.f32.mrf.mxu1 }
 0xa50   :  { %v362_v38 = vadd.f32 %v359_v37, %v338_v36 }
 0xa52   :  { %546 = vtanh.f32 %v362_v38 }
 0xa58   :  { %v547_v39 = vpop.eup %546 }
 0xa59   :  { %v364_v40 = vmul.f32 %v547_v39, %v674_v19 }
 0xa5b   :  { %v365_v41 = vadd.f32 %v364_v40, %v677_v21 }
 0xa5d   :  { %377 = vrot.lane.b32.xlu1 %v365_v41, %s639_s1  ;;  %368 = vrot.lane.b32.xlu2 %v365_v41, %s638_s0  ;;  %v366_v46 = vmul.f32 %v365_v41, %v323_v32 }
 0xab7   :  { %v369_v42 = vpop.permute.xlu2 %368 }
 0xab8   :  { %v371_v43 = vmul.f32 %v369_v42, %v365_v41 }
 0xaba   :  { %373 = vrot.lane.b32.xlu0 %v371_v43, %s639_s1 }
 0xacf   :  { %v378_v44 = vpop.permute.xlu1 %377 }
 0xad0   :  { %v380_v45 = vmul.f32 %v378_v44, %v365_v41 }
 0xad2   :  { %382 = vrot.lane.b32.xlu2 %v380_v45, %s638_s0 }
 0xb2c   :  { %v374_v47 = vpop.permute.xlu0 %373  ;;  %v383_v49 = vpop.permute.xlu2 %382 }
 0xb2d   :  { %v376_v48 = vsub.f32 %v366_v46, %v374_v47 }
 0xb2f   :  { %386 = vrot.lane.b32.xlu0 %v376_v48, %s631_s17 }
 0xba1   :  { %v387_v50 = vpop.permute.xlu0 %386 }
 0xba2   :  { %v389_v51 = vsel %vm70_vm1, %v383_v49, %v387_v50 }
 0xba3   :  { %523 = vmatmul.msk.f32.vlgmr.msrb.gmra.mxu2 %vm73_vm2, %v389_v51 }
 0xc26   :  { %v412_v53 = vpop.f32.mrf.mxu2 }
 0xc27   :  { %v415_v54 = vadd.f32 %v412_v53, %v391_v52 }
 0xc29   :  { %548 = vtanh.f32 %v415_v54 }
 0xc2f   :  { %v549_v55 = vpop.eup %548 }
 0xc30   :  { %v417_v56 = vmul.f32 %v549_v55, %v674_v19 }
 0xc32   :  { %v418_v57 = vadd.f32 %v417_v56, %v677_v21 }
 0xc34   :  { %430 = vrot.lane.b32.xlu0 %v418_v57, %s639_s1  ;;  %421 = vrot.lane.b32.xlu1 %v418_v57, %s638_s0  ;;  %v419_v62 = vmul.f32 %v418_v57, %v376_v48 }
 0xca6   :  { %v431_v58 = vpop.permute.xlu0 %430  ;;  %v422_v59 = vpop.permute.xlu1 %421 }
 0xca7   :  { %v433_v60 = vmul.f32 %v431_v58, %v418_v57  ;;  %v424_v61 = vmul.f32 %v422_v59, %v418_v57 }
 0xca9   :  { %435 = vrot.lane.b32.xlu1 %v433_v60, %s638_s0  ;;  %426 = vrot.lane.b32.xlu2 %v424_v61, %s639_s1 }
 0xd03   :  { %v427_v63 = vpop.permute.xlu2 %426 }
 0xd04   :  { %v429_v0 = vsub.f32 %v419_v62, %v427_v63 }
 0xd06   :  { %439 = vrot.lane.b32.xlu2 %v429_v0, %s631_s17 }
 0xd1b   :  { %v436_v1 = vpop.permute.xlu1 %435 }
 0xd60   :  { %v440_v2 = vpop.permute.xlu2 %439 }
 0xd61   :  { %v442_v3 = vsel %vm70_vm1, %v436_v1, %v440_v2 }
 0xd62   :  { %524 = vmatmul.msk.f32.vlgmr.msrb.gmra.mxu3 %vm73_vm2, %v442_v3 }
 0xde5   :  { %v465_v5 = vpop.f32.mrf.mxu3 }
 0xde6   :  { %v468_v6 = vadd.f32 %v465_v5, %v444_v4 }
 0xde8   :  { %550 = vtanh.f32 %v468_v6 }
 0xdee   :  { %v551_v7 = vpop.eup %550 }
 0xdef   :  { %v470_v8 = vmul.f32 %v551_v7, %v674_v19 }
 0xdf1   :  { %v471_v9 = vadd.f32 %v470_v8, %v677_v21 }
 0xdf3   :  { %474 = vrot.lane.b32.xlu1 %v471_v9, %s638_s0  ;;  %483 = vrot.lane.b32.xlu0 %v471_v9, %s639_s1  ;;  %v472_v21 = vmul.f32 %v471_v9, %v429_v0 }
 0xe65   :  { %v475_v10 = vpop.permute.xlu1 %474  ;;  %v484_v11 = vpop.permute.xlu0 %483 }
 0xe66   :  { %v477_v12 = vmul.f32 %v475_v10, %v471_v9  ;;  %v486_v13 = vmul.f32 %v484_v11, %v471_v9 }
 0xe68   :  { %479 = vrot.lane.b32.xlu0 %v477_v12, %s639_s1  ;;  %488 = vrot.lane.b32.xlu2 %v486_v13, %s638_s0 }
 0xec2   :  { %v489_v14 = vpop.permute.xlu2 %488 }
 0xec3   :  { %492 = vst.msk [vmem:[#allocation2] sm:$0x3] %vm48_vm0, %v489_v14 }
 0xeca   :  { %v497_v19 = vld [vmem:[#allocation2] sm:$0x3] }
 0xecb   :  { %498 = vst.msk [vmem:[#allocation9] sm:$0x3] %vm48_vm0, %v497_v19 }
 0xecc   :  { %509 = dma.vmem_to_hbm [thread:$0]  %s505_s24, 32, %s507_s27, [#allocation6]  }
 0xeda   :  { %v480_v15 = vpop.permute.xlu0 %479 }
 0xedb   :  { %v482_v16 = vsub.f32 %v472_v21, %v480_v15 }
 0xedd   :  { %493 = vst.msk [vmem:[#allocation3] sm:$0x3] %vm48_vm0, %v482_v16 }
 0xede   :  { %628 = dma.done.wait [#allocation6], 32  }
 0xedf   :  { %629 = vsyncadd [#allocation6], 4294967264 }
 0xee0   :  { %514 = vsyncpa [#allocation5], 1 }
 0xee1   :  { %515 = vsyncpa [#allocation8], 1 }
 0xee2   :  { %516 = vsyncpa [#allocation6], 1 }

</bundles_post_ra>
